<compile_context>
chip_gen: v6e
topology: v6e:2x2x1
jax: 0.10.0
libtpu: 0.0.40
codegen_flags: <defaults>
</compile_context>

<pallas_src>
from functools import partial

import jax
import jax.numpy as jnp
from jax.experimental import pallas as pl
from jax.experimental.pallas import tpu as pltpu


# --------------------------------------------------------------------------- #
# Kernels
# --------------------------------------------------------------------------- #
def _softmax_dim0(y, o_ref):
    """softmax over the row axis of a (N, TV) f32 tile; exact reciprocal so each
    column sums to 1 to ~1e-6 (approx recip would relax that to ~1e-3)."""
    m = jnp.max(y, axis=0, keepdims=True)               # (1, TV)   XLU reduce
    e = jnp.exp(y - m)                                   # (N, TV)   EUP
    s_inv = 1.0 / jnp.sum(e, axis=0, keepdims=True)      # TV exact divides, not N*TV
    o_ref[...] = (e * s_inv).astype(o_ref.dtype)         # multiply = spare VALU slot


def _fused_kernel(word_ref, w1_ref, b1_ref, w2_ref, b2_ref, o_ref, h_ref):
    """Fused path: stage 1 once (grid step 0) into resident VMEM scratch, then one
    stage-2 V-column tile per grid step."""

    @pl.when(pl.program_id(0) == 0)
    def _():
        acc = jnp.dot(word_ref[...], w1_ref[...],
                      preferred_element_type=jnp.float32) + b1_ref[...]
        h_ref[...] = jax.nn.sigmoid(acc).astype(h_ref.dtype)   # bf16 for stage-2 MXU

    y = jnp.dot(h_ref[...], w2_ref[...],
                preferred_element_type=jnp.float32) + b2_ref[...]
    _softmax_dim0(y, o_ref)


def _hidden_kernel(word_ref, w1_ref, b1_ref, h_ref, acc_ref):
    """Split path, stage 1: h = sigmoid(word @ w1 + b1), contraction (K) axis tiled
    over the grid with an f32 VMEM accumulator."""
    k = pl.program_id(0)

    @pl.when(k == 0)
    def _():
        acc_ref[...] = jnp.zeros_like(acc_ref)

    acc_ref[...] += jnp.dot(word_ref[...], w1_ref[...],
                            preferred_element_type=jnp.float32)

    @pl.when(k == pl.num_programs(0) - 1)
    def _():
        h_ref[...] = jax.nn.sigmoid(acc_ref[...] + b1_ref[...]).astype(h_ref.dtype)


def _softmax_proj_kernel(h_ref, w2_ref, b2_ref, o_ref):
    """Split path, stage 2: one independent (N, TV) column tile."""
    y = jnp.dot(h_ref[...], w2_ref[...],
                preferred_element_type=jnp.float32) + b2_ref[...]
    _softmax_dim0(y, o_ref)


# --------------------------------------------------------------------------- #
# Tiling / VMEM helpers
# --------------------------------------------------------------------------- #
def _round_up(x, m):
    return ((x + m - 1) // m) * m


def _vmem_limit_bytes():
    """Generation-aware VMEM limit: ~75% of physical capacity, with a fallback
    that is safe on every chip (v7x has only 64 MiB per TensorCore)."""
    try:
        cap = getattr(pltpu.get_tpu_info(), "vmem_capacity_bytes", None)
        if cap:
            return int(cap) * 3 // 4
    except Exception:
        pass
    return 48 * 1024 * 1024


def _pick_tile_v(V, E, N, avail_bytes):
    """Largest multiple-of-256 output-column tile that fits the streaming budget.
    Per column (double-buffered): w2 bf16 (2*E*2 B) + out f32 (2*N*4 B) + b2 f32."""
    per_col = 2 * (E * 2) + 2 * (N * 4) + 2 * 4
    tv = max(256, min((avail_bytes // per_col) // 256 * 256, 2048))
    return min(tv, _round_up(V, 256))       # don't tile wider than the padded vocab


def _pick_tile_k(V, E, N, avail_bytes):
    """Contraction-axis tile for the split-path stage-1 matmul (multiple of 128)."""
    per_col = 2 * (N * 2) + 2 * (E * 2)     # double-buffered word + w1 K-slices, bf16
    tk = max(128, min((avail_bytes // per_col) // 128 * 128, 2048))
    return min(tk, _round_up(V, 128))


# --------------------------------------------------------------------------- #
# Wrapper
# --------------------------------------------------------------------------- #
@partial(jax.jit, static_argnames=("force_split",))
def embedding_forward(word, w1, b1, w2, b2, force_split=False):
    """word: (N, v_dim); w1: (v_dim, e_dim); b1: (1, e_dim);
       w2: (e_dim, v_dim); b2: (1, v_dim)  ->  (N, v_dim) f32, softmax over dim 0."""
    N, V = word.shape
    E = w1.shape[1]

    vmem_limit = _vmem_limit_bytes()
    budget = int(vmem_limit * 0.7)          # headroom for compiler scratch/regalloc
    cparams = lambda sem: pltpu.CompilerParams(
        dimension_semantics=sem, vmem_limit_bytes=vmem_limit)

    # bf16 MXU operands (halves weight DMA bytes); biases stay f32 so they add onto
    # the f32 accumulator; all elementwise math in f32 (v5e has no bf16 VPU/EUP).
    word_bf = word.astype(jnp.bfloat16)
    w1_bf = w1.astype(jnp.bfloat16)
    w2_bf = w2.astype(jnp.bfloat16)
    b1_f32 = b1.astype(jnp.float32)
    b2_f32 = b2.astype(jnp.float32)

    # Footprint of keeping stage 1 fully resident inside the fused kernel.
    resident = N * V * 2 + V * E * 2 + E * 4 + N * E * 2
    fused = (not force_split) and resident <= budget // 2

    if fused:
        # ---- Single fused call: no h HBM round trip, one launch. ----
        tv = _pick_tile_v(V, E, N, budget - resident)
        V_pad = _round_up(V, tv)
        w2p = jnp.pad(w2_bf, ((0, 0), (0, V_pad - V)))
        b2p = jnp.pad(b2_f32, ((0, 0), (0, V_pad - V)))
        # TODO(synk): add pipeline_mode=pl.Buffered(3) on the w2 spec if the w2
        # DMA is still exposed at long grids (costs one extra E x tv bf16 buffer).
        out = pl.pallas_call(
            _fused_kernel,
            out_shape=jax.ShapeDtypeStruct((N, V_pad), jnp.float32),
            grid=(V_pad // tv,),
            in_specs=[
                pl.BlockSpec((N, V), lambda j: (0, 0)),    # word (resident)
                pl.BlockSpec((V, E), lambda j: (0, 0)),    # w1   (resident)
                pl.BlockSpec((1, E), lambda j: (0, 0)),    # b1   (resident)
                pl.BlockSpec((E, tv), lambda j: (0, j)),   # w2 column tile (dbl-buf)
                pl.BlockSpec((1, tv), lambda j: (0, j)),   # b2 column tile
            ],
            out_specs=pl.BlockSpec((N, tv), lambda j: (0, j)),
            scratch_shapes=[pltpu.VMEM((N, E), jnp.bfloat16)],  # h, persists over grid
            # "arbitrary": the pl.when(j == 0) scratch init must precede every other
            # step on the same core -- keeps v7x's second TensorCore correct.
            compiler_params=cparams(("arbitrary",)),
        )(word_bf, w1_bf, b1_f32, w2p, b2p)
        return out[:, :V] if V_pad != V else out

    # ---- Split path (large vocab): K-tiled stage 1 writes h once, then a
    # "parallel" stage 2 streams independent V-column tiles. ----
    tk = _pick_tile_k(V, E, N, budget - (E * 4 + 2 * N * E * 2 + N * E * 4))
    Vk_pad = _round_up(V, tk)
    word_p = jnp.pad(word_bf, ((0, 0), (0, Vk_pad - V)))   # zero K-padding: no-op in dot
    w1_p = jnp.pad(w1_bf, ((0, Vk_pad - V), (0, 0)))
    h = pl.pallas_call(
        _hidden_kernel,
        out_shape=jax.ShapeDtypeStruct((N, E), jnp.bfloat16),
        grid=(Vk_pad // tk,),
        in_specs=[
            pl.BlockSpec((N, tk), lambda k: (0, k)),       # word K-slice
            pl.BlockSpec((tk, E), lambda k: (k, 0)),       # w1 K-slice
            pl.BlockSpec((1, E), lambda k: (0, 0)),        # b1 (resident)
        ],
        out_specs=pl.BlockSpec((N, E), lambda k: (0, 0)),  # resident accumulator output
        scratch_shapes=[pltpu.VMEM((N, E), jnp.float32)],
        compiler_params=cparams(("arbitrary",)),           # reduction axis
    )(word_p, w1_p, b1_f32)

    tv = _pick_tile_v(V, E, N, budget - 2 * N * E * 2)
    V_pad = _round_up(V, tv)
    w2p = jnp.pad(w2_bf, ((0, 0), (0, V_pad - V)))
    b2p = jnp.pad(b2_f32, ((0, 0), (0, V_pad - V)))
    out = pl.pallas_call(
        _softmax_proj_kernel,
        out_shape=jax.ShapeDtypeStruct((N, V_pad), jnp.float32),
        grid=(V_pad // tv,),
        in_specs=[
            pl.BlockSpec((N, E), lambda j: (0, 0)),        # h (resident)
            pl.BlockSpec((E, tv), lambda j: (0, j)),       # w2 column tile
            pl.BlockSpec((1, tv), lambda j: (0, j)),       # b2 column tile
        ],
        out_specs=pl.BlockSpec((N, tv), lambda j: (0, j)),
        compiler_params=cparams(("parallel",)),            # independent tiles -> 2 TCs
    )(h, w2p, b2p)
    return out[:, :V] if V_pad != V else out


# --------------------------------------------------------------------------- #
# Demo / self-test
# --------------------------------------------------------------------------- #
if __name__ == "__main__":
    # Lane-aligned small shapes: batch of 8 "words", v_dim=384, e_dim=128.
    N, v_dim, e_dim = 8, 384, 128

    key = jax.random.PRNGKey(0)
    k_word, k_w1, k_b1, k_w2, k_b2 = jax.random.split(key, 5)

    # Deterministic init mimicking nn.Linear's uniform(-1/sqrt(fan_in), ...).
    bound1 = 1.0 / jnp.sqrt(v_dim)
    bound2 = 1.0 / jnp.sqrt(e_dim)
    # Stored pre-transposed: (in_dim, out_dim).
    w1 = jax.random.uniform(k_w1, (v_dim, e_dim), jnp.float32, -bound1, bound1)
    b1 = jax.random.uniform(k_b1, (1, e_dim), jnp.float32, -bound1, bound1)
    w2 = jax.random.uniform(k_w2, (e_dim, v_dim), jnp.float32, -bound2, bound2)
    b2 = jax.random.uniform(k_b2, (1, v_dim), jnp.float32, -bound2, bound2)

    word = jax.random.normal(k_word, (N, v_dim), jnp.float32)

    out = jax.block_until_ready(embedding_forward(word, w1, b1, w2, b2))
    assert out.shape == (N, v_dim)
    assert out.dtype == jnp.float32

    # Reference 1: same bf16-operand / f32-accumulate policy as the kernels.
    wb, w1b, w2b = (a.astype(jnp.bfloat16) for a in (word, w1, w2))
    ref_pre = jnp.dot(wb, w1b, preferred_element_type=jnp.float32) + b1
    ref_h = jax.nn.sigmoid(ref_pre).astype(jnp.bfloat16)
    ref_y = jnp.dot(ref_h, w2b, preferred_element_type=jnp.float32) + b2
    ref = jax.nn.softmax(ref_y, axis=0)
    assert jnp.allclose(out, ref, atol=2e-3, rtol=2e-3), float(
        jnp.max(jnp.abs(out - ref)))

    # Reference 2: full-f32 PyTorch-semantics reference (bf16 MXU operands only
    # introduce ~1e-3-level differences).
    ref_f32 = jax.nn.softmax(jax.nn.sigmoid(word @ w1 + b1) @ w2 + b2, axis=0)
    assert jnp.allclose(out, ref_f32, atol=5e-3, rtol=5e-2)

    # Columns of a dim=0 softmax sum to 1 (exact in-kernel reciprocal preserves this).
    assert jnp.allclose(jnp.sum(out, axis=0), jnp.ones((v_dim,)), atol=1e-5)

    # Also exercise the large-vocab split path (K-tiled stage 1 + parallel stage 2).
    out_split = jax.block_until_ready(
        embedding_forward(word, w1, b1, w2, b2, force_split=True))
    assert jnp.allclose(out_split, ref, atol=2e-3, rtol=2e-3)
    assert jnp.allclose(jnp.sum(out_split, axis=0), jnp.ones((v_dim,)), atol=1e-5)

    print("KERNEL_OK")
</pallas_src>

<mosaic_0001>
module attributes {stable_mosaic.version = 11 : i64} {
  func.func @_fused_kernel(%arg0: i32, %arg1: memref<8x384xbf16, #tpu.memory_space<vmem>>, %arg2: memref<384x128xbf16, #tpu.memory_space<vmem>>, %arg3: memref<1x128xf32, #tpu.memory_space<vmem>>, %arg4: memref<128x512xbf16, #tpu.memory_space<vmem>>, %arg5: memref<1x512xf32, #tpu.memory_space<vmem>>, %arg6: memref<8x512xf32, #tpu.memory_space<vmem>>, %arg7: memref<8x128xbf16, #tpu.memory_space<vmem>>) attributes {dimension_semantics = [#tpu.dimension_semantics<arbitrary>], iteration_bounds = array<i64: 1>, scalar_prefetch = 0 : i64, scratch_operands = 1 : i64, tpu.core_type = #tpu.core_type<tc>, window_params = [{pipeline_mode = #tpu.pipeline_mode<synchronous>, transform_indices = @transform_0, window_bounds = array<i64: 8, 384>}, {pipeline_mode = #tpu.pipeline_mode<synchronous>, transform_indices = @transform_1, window_bounds = array<i64: 384, 128>}, {pipeline_mode = #tpu.pipeline_mode<synchronous>, transform_indices = @transform_2, window_bounds = array<i64: 1, 128>}, {transform_indices = @transform_3, window_bounds = array<i64: 128, 512>}, {transform_indices = @transform_4, window_bounds = array<i64: 1, 512>}, {transform_indices = @transform_5, window_bounds = array<i64: 8, 512>}]} {
    %c0_i32 = arith.constant 0 : i32
    %0 = arith.cmpi eq, %arg0, %c0_i32 : i32
    %1 = arith.extui %0 : i1 to i32
    %c0_i32_0 = arith.constant 0 : i32
    %2 = arith.cmpi ne, %1, %c0_i32_0 : i32
    scf.if %2 {
      %c0_11 = arith.constant 0 : index
      %c0_12 = arith.constant 0 : index
      %21 = vector.load %arg1[%c0_11, %c0_12] : memref<8x384xbf16, #tpu.memory_space<vmem>>, vector<8x384xbf16>
      %c0_13 = arith.constant 0 : index
      %c0_14 = arith.constant 0 : index
      %22 = vector.load %arg2[%c0_13, %c0_14] : memref<384x128xbf16, #tpu.memory_space<vmem>>, vector<384x128xbf16>
      %cst_15 = arith.constant dense<0.000000e+00> : vector<8x128xf32>
      %23 = tpu.matmul %21, %22, %cst_15 {dimension_numbers = #tpu.dot_dimension_numbers<[1], [0], [0], [1], [0, 0, 1, 1], [], []>} : vector<8x384xbf16>, vector<384x128xbf16>, vector<8x128xf32> -> vector<8x128xf32>
      %c0_16 = arith.constant 0 : index
      %c0_17 = arith.constant 0 : index
      %24 = vector.load %arg3[%c0_16, %c0_17] : memref<1x128xf32, #tpu.memory_space<vmem>>, vector<1x128xf32>
      %25 = vector.broadcast %24 : vector<1x128xf32> to vector<8x128xf32>
      %26 = arith.addf %23, %25 : vector<8x128xf32>
      %27 = arith.negf %26 : vector<8x128xf32>
      %28 = math.exp %27 : vector<8x128xf32>
      %cst_18 = arith.constant 1.000000e+00 : f32
      %29 = vector.broadcast %cst_18 : f32 to vector<8x128xf32>
      %30 = arith.addf %29, %28 : vector<8x128xf32>
      %31 = arith.divf %29, %30 : vector<8x128xf32>
      %32 = arith.truncf %31 : vector<8x128xf32> to vector<8x128xbf16>
      %c0_19 = arith.constant 0 : index
      %c0_20 = arith.constant 0 : index
      %33 = vector.load %arg7[%c0_19, %c0_20] : memref<8x128xbf16, #tpu.memory_space<vmem>>, vector<8x128xbf16>
      tpu.vector_store %arg7[%c0_19, %c0_20], %32 {strides = array<i32>} : memref<8x128xbf16, #tpu.memory_space<vmem>>, vector<8x128xbf16>,
    } else {
    }
    %c0 = arith.constant 0 : index
    %c0_1 = arith.constant 0 : index
    %3 = vector.load %arg7[%c0, %c0_1] : memref<8x128xbf16, #tpu.memory_space<vmem>>, vector<8x128xbf16>
    %c0_2 = arith.constant 0 : index
    %c0_3 = arith.constant 0 : index
    %4 = vector.load %arg4[%c0_2, %c0_3] : memref<128x512xbf16, #tpu.memory_space<vmem>>, vector<128x512xbf16>
    %cst = arith.constant dense<0.000000e+00> : vector<8x512xf32>
    %5 = tpu.matmul %3, %4, %cst {dimension_numbers = #tpu.dot_dimension_numbers<[1], [0], [0], [1], [0, 0, 1, 1], [], []>} : vector<8x128xbf16>, vector<128x512xbf16>, vector<8x512xf32> -> vector<8x512xf32>
    %c0_4 = arith.constant 0 : index
    %c0_5 = arith.constant 0 : index
    %6 = vector.load %arg5[%c0_4, %c0_5] : memref<1x512xf32, #tpu.memory_space<vmem>>, vector<1x512xf32>
    %7 = vector.broadcast %6 : vector<1x512xf32> to vector<8x512xf32>
    %8 = arith.addf %5, %7 : vector<8x512xf32>
    %cst_6 = arith.constant dense<0xFF800000> : vector<512xf32>
    %9 = vector.multi_reduction <maximumf>, %8, %cst_6 [0] : vector<8x512xf32> to vector<512xf32>
    %10 = vector.shape_cast %9 : vector<512xf32> to vector<1x512xf32>
    %11 = vector.broadcast %10 : vector<1x512xf32> to vector<8x512xf32>
    %12 = arith.subf %8, %11 : vector<8x512xf32>
    %13 = math.exp %12 : vector<8x512xf32>
    %cst_7 = arith.constant dense<0.000000e+00> : vector<512xf32>
    %14 = vector.multi_reduction <add>, %13, %cst_7 [0] : vector<8x512xf32> to vector<512xf32>
    %15 = vector.shape_cast %14 : vector<512xf32> to vector<1x512xf32>
    %cst_8 = arith.constant 1.000000e+00 : f32
    %16 = vector.broadcast %cst_8 : f32 to vector<1x512xf32>
    %17 = arith.divf %16, %15 : vector<1x512xf32>
    %18 = vector.broadcast %17 : vector<1x512xf32> to vector<8x512xf32>
    %19 = arith.mulf %13, %18 : vector<8x512xf32>
    %c0_9 = arith.constant 0 : index
    %c0_10 = arith.constant 0 : index
    %20 = vector.load %arg6[%c0_9, %c0_10] : memref<8x512xf32, #tpu.memory_space<vmem>>, vector<8x512xf32>
    tpu.vector_store %arg6[%c0_9, %c0_10], %19 {strides = array<i32>} : memref<8x512xf32, #tpu.memory_space<vmem>>, vector<8x512xf32>,
    return
  }
  func.func @transform_0(%arg0: i32) -> (i32, i32) {
    %c0_i32 = arith.constant 0 : i32
    %c0_i32_0 = arith.constant 0 : i32
    %c0_i32_1 = arith.constant 0 : i32
    return %c0_i32, %c0_i32_0 : i32, i32
  }
  func.func @transform_1(%arg0: i32) -> (i32, i32) {
    %c0_i32 = arith.constant 0 : i32
    %c0_i32_0 = arith.constant 0 : i32
    %c0_i32_1 = arith.constant 0 : i32
    return %c0_i32, %c0_i32_0 : i32, i32
  }
  func.func @transform_2(%arg0: i32) -> (i32, i32) {
    %c0_i32 = arith.constant 0 : i32
    %c0_i32_0 = arith.constant 0 : i32
    %c0_i32_1 = arith.constant 0 : i32
    return %c0_i32, %c0_i32_0 : i32, i32
  }
  func.func @transform_3(%arg0: i32) -> (i32, i32) {
    %c0_i32 = arith.constant 0 : i32
    %c0_i32_0 = arith.constant 0 : i32
    return %c0_i32, %arg0 : i32, i32
  }
  func.func @transform_4(%arg0: i32) -> (i32, i32) {
    %c0_i32 = arith.constant 0 : i32
    %c0_i32_0 = arith.constant 0 : i32
    return %c0_i32, %arg0 : i32, i32
  }
  func.func @transform_5(%arg0: i32) -> (i32, i32) {
    %c0_i32 = arith.constant 0 : i32
    %c0_i32_0 = arith.constant 0 : i32
    return %c0_i32, %arg0 : i32, i32
  }
}

</mosaic_0001>

<bundles_post_ra>
// kernel: embedding_forward.1
= control target key start
LH: loop header
LB: loop body
LE: loop exit
PB: predicated region body
PF: predicated region fallthrough
CT: control target
= control target key end

     0   :  { %v912_v1 = vmov 0.0   ;;  %vm913_vm0 = vmmov 0   ;;  %v914_v60 = vmov 0   ;;  %s1137_s1 = inlined_call_operand.vmem [shape: bf16[384,128], index: 1, kind: input, shape index: {}]   ;;  %s1138_s0 = inlined_call_operand.vmem [shape: bf16[8,384], index: 0, kind: input, shape index: {}]   ;;  %s1139_s3 = inlined_call_operand.vmem [shape: bf16[128,512], index: 3, kind: input, shape index: {}]   ;;  %s1140_s2 = inlined_call_operand.vmem [shape: f32[1,128], index: 2, kind: input, shape index: {}]   ;;  %s1141_s4 = inlined_call_operand.vmem [shape: f32[1,512], index: 4, kind: input, shape index: {}]   ;;  %s1142_s5 = inlined_call_operand.vmem [shape: f32[8,512], index: 5, kind: output, shape index: {}]  }
   0x1   :  { %v817_v0 = vld [vmem:[%s1137_s1 + $0x78] sm:$0xff]   ;;  %794 = vmatprep.subr.bf16.mxu1 %v912_v1  ;;  %810 = vmatprep.mubr.msk.bf16.mxu1 %vm913_vm0, %v912_v1  ;;  %v820_v4 = vld [vmem:[%s1137_s1 + $0x70] sm:$0xff]   ;;  %v823_v7 = vld [vmem:[%s1137_s1 + $0x68] sm:$0xff]  }
   0x2   :  { %v818_v2 = vld [vmem:[%s1137_s1 + $0x38] sm:$0xff]   ;;  %763 = vmatprep.subr.bf16.mxu0 %v817_v0  ;;  %v821_v5 = vld [vmem:[%s1137_s1 + $0x30] sm:$0xff]   ;;  %v824_v8 = vld [vmem:[%s1137_s1 + $0x28] sm:$0xff]  }
   0x3   :  { %v819_v3 = vld [vmem:[%s1137_s1 + $0xb8] sm:$0xff]   ;;  %764 = vmatpush3.bf16.msra.mxu0 %v818_v2  ;;  %v822_v6 = vld [vmem:[%s1137_s1 + $0xb0] sm:$0xff]   ;;  %v825_v9 = vld [vmem:[%s1137_s1 + $0xa8] sm:$0xff]  }
   0x4   :  { %795 = vmatpush3.bf16.msra.mxu1 %v819_v3  ;;  %765 = vmatprep.subr.bf16.mxu0 %v820_v4  ;;  %v826_v10 = vld [vmem:[%s1137_s1 + $0x60] sm:$0xff]   ;;  %v829_v13 = vld [vmem:[%s1137_s1 + $0x58] sm:$0xff]   ;;  %v832_v16 = vld [vmem:[%s1137_s1 + $0x50] sm:$0xff]  }
   0x5   :  { %796 = vmatprep.subr.bf16.mxu1 %v912_v1  ;;  %v827_v11 = vld [vmem:[%s1137_s1 + $0x20] sm:$0xff]   ;;  %v830_v14 = vld [vmem:[%s1137_s1 + $0x18] sm:$0xff]   ;;  %v833_v17 = vld [vmem:[%s1137_s1 + $0x10] sm:$0xff]  }
   0x6   :  { %v828_v12 = vld [vmem:[%s1137_s1 + $0xa0] sm:$0xff]   ;;  %v831_v15 = vld [vmem:[%s1137_s1 + $0x98] sm:$0xff]   ;;  %v834_v18 = vld [vmem:[%s1137_s1 + $0x90] sm:$0xff]  }
   0x7   :  { %766 = vmatpush3.bf16.msra.mxu0 %v821_v5  ;;  %v835_v19 = vld [vmem:[%s1137_s1 + $0x48] sm:$0xff]   ;;  %v838_v22 = vld [vmem:[%s1137_s1 + $0x40] sm:$0xff]  }
   0x8   :  { %797 = vmatpush3.bf16.msra.mxu1 %v822_v6  ;;  %767 = vmatprep.subr.bf16.mxu0 %v823_v7  ;;  %v836_v20 = vld [vmem:[%s1137_s1 + $0x8] sm:$0xff]   ;;  %v25_v23 = vld [vmem:[%s1138_s0] sm:$0xff] }
   0x9   :  { %798 = vmatprep.subr.bf16.mxu1 %v912_v1  ;;  %v837_v21 = vld [vmem:[%s1137_s1 + $0x88] sm:$0xff]   ;;  %v704_v24 = vcombine.high %v25_v23, %v25_v23  ;;  %v839_v25 = vld [vmem:[%s1137_s1] sm:$0xff]   ;;  %v703_v27 = vcombine.low %v25_v23, %v25_v23 }
   0xa   :  { %v840_v26 = vld [vmem:[%s1137_s1 + $0x80] sm:$0xff]   ;;  %v843_v28 = vld [vmem:[%s1138_s0 + $0x8] ss:$0 sps:$4 sm:$0xff]   ;;  %v849_v32 = vld [vmem:[%s1139_s3 + $0xec] ss:$16 sps:$4 sm:$0xff]  }
   0xb   :  { %768 = vmatpush3.bf16.msra.mxu0 %v824_v8  ;;  %269 = vmatprep.mubr.bf16.mxu0 %v704_v24  ;;  %v846_v29 = vld [vmem:[%s1139_s3 + $0xe4] ss:$16 sps:$4 sm:$0xff]   ;;  %v844_v30 = vld [vmem:[%s1139_s3 + $0xe0] ss:$16 sps:$4 sm:$0xff]   ;;  %v847_v31 = vld [vmem:[%s1139_s3 + $0xe8] ss:$16 sps:$4 sm:$0xff]  }
   0xc   :  { %799 = vmatpush3.bf16.msra.mxu1 %v825_v9  ;;  %769 = vmatprep.subr.bf16.mxu0 %v826_v10  ;;  %v852_v33 = vld [vmem:[%s1139_s3 + $0xc4] ss:$16 sps:$4 sm:$0xff]   ;;  %v855_v34 = vld [vmem:[%s1139_s3 + $0xcc] ss:$16 sps:$4 sm:$0xff]   ;;  %v850_v35 = vld [vmem:[%s1139_s3 + $0xc0] ss:$16 sps:$4 sm:$0xff]  }
   0xd   :  { %800 = vmatprep.subr.bf16.mxu1 %v912_v1  ;;  %v853_v36 = vld [vmem:[%s1139_s3 + $0xc8] ss:$16 sps:$4 sm:$0xff]   ;;  %v858_v37 = vld [vmem:[%s1139_s3 + $0xa4] ss:$16 sps:$4 sm:$0xff]   ;;  %v861_v38 = vld [vmem:[%s1139_s3 + $0xac] ss:$16 sps:$4 sm:$0xff]  }
   0xe   :  { %v856_v39 = vld [vmem:[%s1139_s3 + $0xa0] ss:$16 sps:$4 sm:$0xff]   ;;  %v859_v40 = vld [vmem:[%s1139_s3 + $0xa8] ss:$16 sps:$4 sm:$0xff]   ;;  %v864_v41 = vld [vmem:[%s1139_s3 + $0x84] ss:$16 sps:$4 sm:$0xff]  }
   0xf   :  { %770 = vmatpush3.bf16.msra.mxu0 %v827_v11  ;;  %v867_v42 = vld [vmem:[%s1139_s3 + $0x8c] ss:$16 sps:$4 sm:$0xff]   ;;  %v862_v43 = vld [vmem:[%s1139_s3 + $0x80] ss:$16 sps:$4 sm:$0xff]   ;;  %v865_v44 = vld [vmem:[%s1139_s3 + $0x88] ss:$16 sps:$4 sm:$0xff]  }
  0x10   :  { %801 = vmatpush3.bf16.msra.mxu1 %v828_v12  ;;  %771 = vmatprep.subr.bf16.mxu0 %v829_v13  ;;  %v870_v45 = vld [vmem:[%s1139_s3 + $0x64] ss:$16 sps:$4 sm:$0xff]   ;;  %v873_v46 = vld [vmem:[%s1139_s3 + $0x6c] ss:$16 sps:$4 sm:$0xff]   ;;  %v868_v47 = vld [vmem:[%s1139_s3 + $0x60] ss:$16 sps:$4 sm:$0xff]  }
  0x11   :  { %802 = vmatprep.subr.bf16.mxu1 %v912_v1  ;;  %v871_v48 = vld [vmem:[%s1139_s3 + $0x68] ss:$16 sps:$4 sm:$0xff]   ;;  %v876_v49 = vld [vmem:[%s1139_s3 + $0x44] ss:$16 sps:$4 sm:$0xff]   ;;  %v879_v50 = vld [vmem:[%s1139_s3 + $0x4c] ss:$16 sps:$4 sm:$0xff]  }
  0x12   :  { %v874_v51 = vld [vmem:[%s1139_s3 + $0x40] ss:$16 sps:$4 sm:$0xff]   ;;  %v877_v52 = vld [vmem:[%s1139_s3 + $0x48] ss:$16 sps:$4 sm:$0xff]   ;;  %v882_v53 = vld [vmem:[%s1139_s3 + $0x24] ss:$16 sps:$4 sm:$0xff]  }
  0x13   :  { %772 = vmatpush3.bf16.msra.mxu0 %v830_v14  ;;  %v885_v54 = vld [vmem:[%s1139_s3 + $0x2c] ss:$16 sps:$4 sm:$0xff]   ;;  %v880_v55 = vld [vmem:[%s1139_s3 + $0x20] ss:$16 sps:$4 sm:$0xff]   ;;  %v883_v56 = vld [vmem:[%s1139_s3 + $0x28] ss:$16 sps:$4 sm:$0xff]  }
  0x14   :  { %803 = vmatpush3.bf16.msra.mxu1 %v831_v15  ;;  %773 = vmatprep.subr.bf16.mxu0 %v832_v16  ;;  %v888_v57 = vld [vmem:[%s1139_s3 + $0x4] ss:$16 sps:$4 sm:$0xff]   ;;  %v891_v58 = vld [vmem:[%s1139_s3 + $0xc] ss:$16 sps:$4 sm:$0xff]   ;;  %v886_v59 = vld [vmem:[%s1139_s3] ss:$16 sps:$4 sm:$0xff]   ;;  %v360_v16 = vlaneseq }
  0x15   :  { %804 = vmatprep.subr.bf16.mxu1 %v912_v1  ;;  %v889_v61 = vld [vmem:[%s1139_s3 + $0x8] ss:$16 sps:$4 sm:$0xff]   ;;  %v702_v0 = vld [vmem:[%s1140_s2] ss:$0 sm:$0xff] }
  0x17   :  { %774 = vmatpush3.bf16.msra.mxu0 %v833_v17  ;;  %v361_v17 = vshrl.u32 %v360_v16, 7 }
  0x18   :  { %805 = vmatpush3.bf16.msra.mxu1 %v834_v18  ;;  %775 = vmatprep.subr.bf16.mxu0 %v835_v19 }
  0x19   :  { %806 = vmatprep.subr.bf16.mxu1 %v912_v1  ;;  %v362_v18 = vsub.s32 0, %v361_v17  ;;  %v370_v19 = vsub.s32 2, %v361_v17 }
  0x1b   :  { %776 = vmatpush3.bf16.msra.mxu0 %v836_v20  ;;  %v358_v20 = vld [vmem:[%s1141_s4] sm:$0xf] }
  0x1c   :  { %807 = vmatpush3.bf16.msra.mxu1 %v837_v21  ;;  %777 = vmatprep.subr.bf16.mxu0 %v838_v22  ;;  %v366_v21 = vsub.s32 1, %v361_v17  ;;  %v374_v22 = vsub.s32 3, %v361_v17  ;;  %v363_v23 = vrot.slane %v358_v20, %v362_v18  ;;  %v371_v24 = vrot.slane %v358_v20, %v370_v19 }
  0x1d   :  { %808 = vmatprep.subr.bf16.mxu1 %v912_v1 }
  0x1f   :  { %778 = vmatpush3.bf16.msra.mxu0 %v839_v25  ;;  %v367_v25 = vrot.slane %v358_v20, %v366_v21 }
  0x20   :  { %809 = vmatpush3.bf16.msra.mxu1 %v840_v26  ;;  %540 = vmatprep.subr.bf16.mxu0 %v846_v29  ;;  %v375_v26 = vrot.slane %v358_v20, %v374_v22 }
  0x21   :  { %581 = vmatprep.subr.bf16.mxu1 %v849_v32 }
  0x22   :  { %270 = vmatmul.mubr.bf16.vlgmr.msra.gmra.mxu0 %v703_v27 }
  0x23   :  { %811 = vmatmul.mubr.bf16.vlgmr.msra.gmra.mxu1 %v843_v28  ;;  %541 = vmatpush1.bf16.msra.mxu0 %v844_v30 }
  0x24   :  { %582 = vmatpush1.bf16.msra.mxu1 %v847_v31  ;;  %542 = vmatprep.subr.bf16.mxu0 %v852_v33 }
  0x25   :  { %583 = vmatprep.subr.bf16.mxu1 %v855_v34  ;;  %572 = vmatprep.mubr.bf16.mxu0 %v914_v60 }
  0x26   :  { %613 = vmatprep.mubr.bf16.mxu1 %v914_v60 }
  0x27   :  { %543 = vmatpush1.bf16.msra.mxu0 %v850_v35 }
  0x28   :  { %584 = vmatpush1.bf16.msra.mxu1 %v853_v36  ;;  %544 = vmatprep.subr.bf16.mxu0 %v858_v37 }
  0x29   :  { %585 = vmatprep.subr.bf16.mxu1 %v861_v38 }
  0x2b   :  { %545 = vmatpush1.bf16.msra.mxu0 %v856_v39 }
  0x2c   :  { %586 = vmatpush1.bf16.msra.mxu1 %v859_v40  ;;  %546 = vmatprep.subr.bf16.mxu0 %v864_v41 }
  0x2d   :  { %587 = vmatprep.subr.bf16.mxu1 %v867_v42 }
  0x2f   :  { %547 = vmatpush1.bf16.msra.mxu0 %v862_v43 }
  0x30   :  { %588 = vmatpush1.bf16.msra.mxu1 %v865_v44  ;;  %548 = vmatprep.subr.bf16.mxu0 %v870_v45 }
  0x31   :  { %589 = vmatprep.subr.bf16.mxu1 %v873_v46 }
  0x33   :  { %549 = vmatpush1.bf16.msra.mxu0 %v868_v47 }
  0x34   :  { %590 = vmatpush1.bf16.msra.mxu1 %v871_v48  ;;  %550 = vmatprep.subr.bf16.mxu0 %v876_v49 }
  0x35   :  { %591 = vmatprep.subr.bf16.mxu1 %v879_v50 }
  0x37   :  { %551 = vmatpush1.bf16.msra.mxu0 %v874_v51 }
  0x38   :  { %592 = vmatpush1.bf16.msra.mxu1 %v877_v52  ;;  %552 = vmatprep.subr.bf16.mxu0 %v882_v53 }
  0x39   :  { %593 = vmatprep.subr.bf16.mxu1 %v885_v54 }
  0x3b   :  { %553 = vmatpush1.bf16.msra.mxu0 %v880_v55 }
  0x3c   :  { %554 = vmatprep.subr.bf16.mxu0 %v888_v57  ;;  %594 = vmatpush1.bf16.msra.mxu1 %v883_v56 }
  0x3d   :  { %595 = vmatprep.subr.bf16.mxu1 %v891_v58 }
  0x3f   :  { %555 = vmatpush1.bf16.msra.mxu0 %v886_v59 }
  0x40   :  { %596 = vmatpush1.bf16.msra.mxu1 %v889_v61 }
  0xe2   :  { %v779_v62 = vpop.f32.mrf.mxu0 }
  0xe3   :  { %v311_v63 = vpop.f32.mrf.mxu1 }
  0xe4   :  { %v780_v1 = vpop.f32.mrf.mxu0 }
  0xe5   :  { %v781_v2 = vadd.f32 %v780_v1, %v779_v62  ;;  %v812_v3 = vpop.f32.mrf.mxu1 }
  0xe6   :  { %v782_v4 = vpop.f32.mrf.mxu0 }
  0xe7   :  { %v272_v5 = vadd.f32 %v781_v2, %v702_v0  ;;  %v314_v6 = vpop.f32.mrf.mxu1 }
  0xe8   :  { %v783_v7 = vpop.f32.mrf.mxu0 }
  0xe9   :  { %v312_v8 = vadd.f32 %v311_v63, %v272_v5  ;;  %v813_v9 = vpop.f32.mrf.mxu1 }
  0xeb   :  { %v730_v10 = vmul.f32 -1.442695, %v312_v8 }
  0xed   :  { %892 = vpow2.f32 %v730_v10 }
  0xfa   :  { %v893_v11 = vpop.eup %892 }
  0xfb   :  { %v320_v12 = vadd.f32 1.0, %v893_v11 }
  0xfd   :  { %894 = vrcp.f32 %v320_v12 }
 0x10a   :  { %v895_v13 = vpop.eup %894 }
 0x10b   :  { %v323_v14 = vpack.c.bf16 %v895_v13, %v895_v13 }
 0x10d   :  { %324 = vst [vmem:[#allocation2] sm:$0xf] %v323_v14 }
 0x114   :  { %v325_v15 = vld [vmem:[#allocation2] sm:$0xf] }
 0x115   :  { %573 = vmatmul.mubr.bf16.vlgmr.msra.gmra.mxu0 %v325_v15  ;;  %614 = vmatmul.mubr.bf16.vlgmr.msra.gmra.mxu1 %v325_v15 }
 0x1d5   :  { %v574_v27 = vpop.f32.mrf.mxu0  ;;  %v615_v28 = vpop.f32.mrf.mxu1 }
 0x1d6   :  { %v575_v29 = vadd.f32 %v574_v27, %v363_v23  ;;  %v616_v30 = vadd.f32 %v615_v28, %v371_v24 }
 0x1d7   :  { %v576_v31 = vpop.f32.mrf.mxu0  ;;  %v617_v32 = vpop.f32.mrf.mxu1 }
 0x1d8   :  { %v622_v33 = vrot.slane %v575_v29, 4  ;;  %v634_v34 = vrot.slane %v616_v30, 4  ;;  %v577_v35 = vadd.f32 %v576_v31, %v367_v25  ;;  %v618_v36 = vadd.f32 %v617_v32, %v375_v26 }
 0x1d9   :  { %v578_v37 = vpop.f32.mrf.mxu0  ;;  %v619_v38 = vpop.f32.mrf.mxu1 }
 0x1da   :  { %v623_v39 = vmax.f32 %v575_v29, %v622_v33  ;;  %v635_v40 = vmax.f32 %v616_v30, %v634_v34  ;;  %v628_v41 = vrot.slane %v577_v35, 4  ;;  %v640_v42 = vrot.slane %v618_v36, 4 }
 0x1db   :  { %v579_v43 = vpop.f32.mrf.mxu0  ;;  %v620_v44 = vpop.f32.mrf.mxu1 }
 0x1dc   :  { %v624_v45 = vrot.slane %v623_v39, 2  ;;  %v636_v46 = vrot.slane %v635_v40, 2  ;;  %v629_v47 = vmax.f32 %v577_v35, %v628_v41  ;;  %v641_v48 = vmax.f32 %v618_v36, %v640_v42 }
 0x1de   :  { %v625_v49 = vmax.f32 %v623_v39, %v624_v45  ;;  %v637_v50 = vmax.f32 %v635_v40, %v636_v46  ;;  %v630_v51 = vrot.slane %v629_v47, 2  ;;  %v642_v52 = vrot.slane %v641_v48, 2 }
 0x1e0   :  { %v626_v53 = vrot.slane %v625_v49, 1  ;;  %v638_v54 = vrot.slane %v637_v50, 1  ;;  %v631_v55 = vmax.f32 %v629_v47, %v630_v51  ;;  %v643_v56 = vmax.f32 %v641_v48, %v642_v52 }
 0x1e2   :  { %v627_v57 = vmax.f32 %v625_v49, %v626_v53  ;;  %v639_v58 = vmax.f32 %v637_v50, %v638_v54  ;;  %v632_v59 = vrot.slane %v631_v55, 1  ;;  %v644_v60 = vrot.slane %v643_v56, 1 }
 0x1e4   :  { %v646_v61 = vsub.f32 %v575_v29, %v627_v57  ;;  %v648_v62 = vsub.f32 %v616_v30, %v639_v58  ;;  %v633_v63 = vmax.f32 %v631_v55, %v632_v59  ;;  %v645_v0 = vmax.f32 %v643_v56, %v644_v60 }
 0x1e6   :  { %v650_v1 = vmul.f32 1.442695, %v646_v61  ;;  %v654_v2 = vmul.f32 1.442695, %v648_v62  ;;  %v647_v3 = vsub.f32 %v577_v35, %v633_v63  ;;  %v649_v4 = vsub.f32 %v618_v36, %v645_v0 }
 0x1e8   :  { %896 = vpow2.f32 %v650_v1  ;;  %v652_v5 = vmul.f32 1.442695, %v647_v3  ;;  %v656_v6 = vmul.f32 1.442695, %v649_v4 }
 0x1e9   :  { %898 = vpow2.f32 %v654_v2 }
 0x1ea   :  { %900 = vpow2.f32 %v652_v5 }
 0x1eb   :  { %902 = vpow2.f32 %v656_v6 }
 0x1f5   :  { %v897_v7 = vpop.eup %896 }
 0x1f6   :  { %v899_v8 = vpop.eup %898  ;;  %v658_v9 = vrot.slane %v897_v7, 4 }
 0x1f7   :  { %v901_v10 = vpop.eup %900  ;;  %v670_v11 = vrot.slane %v899_v8, 4 }
 0x1f8   :  { %v903_v12 = vpop.eup %902  ;;  %v659_v13 = vadd.f32 %v897_v7, %v658_v9  ;;  %v664_v14 = vrot.slane %v901_v10, 4 }
 0x1f9   :  { %v671_v15 = vadd.f32 %v899_v8, %v670_v11  ;;  %v676_v16 = vrot.slane %v903_v12, 4 }
 0x1fa   :  { %v660_v17 = vrot.slane %v659_v13, 2  ;;  %v665_v18 = vadd.f32 %v901_v10, %v664_v14 }
 0x1fb   :  { %v672_v19 = vrot.slane %v671_v15, 2  ;;  %v677_v20 = vadd.f32 %v903_v12, %v676_v16 }
 0x1fc   :  { %v661_v21 = vadd.f32 %v660_v17, %v659_v13  ;;  %v666_v22 = vrot.slane %v665_v18, 2 }
 0x1fd   :  { %v673_v23 = vadd.f32 %v672_v19, %v671_v15  ;;  %v678_v24 = vrot.slane %v677_v20, 2 }
 0x1fe   :  { %v662_v25 = vrot.slane %v661_v21, 1  ;;  %v667_v26 = vadd.f32 %v666_v22, %v665_v18 }
 0x1ff   :  { %v674_v27 = vrot.slane %v673_v23, 1  ;;  %v679_v28 = vadd.f32 %v678_v24, %v677_v20 }
 0x200   :  { %v663_v29 = vadd.f32 %v662_v25, %v661_v21  ;;  %v668_v30 = vrot.slane %v667_v26, 1 }
 0x201   :  { %v675_v31 = vadd.f32 %v674_v27, %v673_v23  ;;  %v680_v32 = vrot.slane %v679_v28, 1 }
 0x202   :  { %904 = vrcp.f32 %v663_v29  ;;  %v669_v33 = vadd.f32 %v668_v30, %v667_v26 }
 0x203   :  { %906 = vrcp.f32 %v675_v31  ;;  %v681_v34 = vadd.f32 %v680_v32, %v679_v28 }
 0x204   :  { %908 = vrcp.f32 %v669_v33 }
 0x205   :  { %910 = vrcp.f32 %v681_v34 }
 0x20f   :  { %v905_v35 = vpop.eup %904 }
 0x210   :  { %v907_v36 = vpop.eup %906  ;;  %v690_v37 = vmul.f32 %v905_v35, %v897_v7 }
 0x211   :  { %v909_v38 = vpop.eup %908  ;;  %v692_v39 = vmul.f32 %v907_v36, %v899_v8 }
 0x212   :  { %v911_v40 = vpop.eup %910  ;;  %694 = vst [vmem:[%s1142_s5] sm:$0xff] %v690_v37  ;;  %v691_v41 = vmul.f32 %v909_v38, %v901_v10 }
 0x213   :  { %696 = vst [vmem:[%s1142_s5 + $0x10] sm:$0xff] %v692_v39  ;;  %v693_v42 = vmul.f32 %v911_v40, %v903_v12 }
 0x214   :  { %695 = vst [vmem:[%s1142_s5 + $0x8] sm:$0xff] %v691_v41 }
 0x215   :  { %697 = vst [vmem:[%s1142_s5 + $0x18] sm:$0xff] %v693_v42 }

</bundles_post_ra>
